<compile_context>
chip_gen: v7x
topology: tpu7x:2x2x1
jax: 0.10.0
libtpu: 0.0.40
codegen_flags: <defaults>
</compile_context>

<pallas_src>
import functools

import jax
import jax.numpy as jnp
from jax.experimental import pallas as pl
from jax.experimental.pallas import tpu as pltpu


def _ca_kernel(x_ref, w1_ref, b1_ref, w2t_ref, b2_ref, o_ref, *, channels, hw):
    # x_ref  : (BB, C*HW)  one batch sample per row, channels contiguous on lanes
    # w1_ref : (C, M) f32  linear1 weight (in x out)
    # b1_ref : (1, M) f32
    # w2t_ref: (C, M) f32  linear2 weight transposed (w2t[c, m] = w2[m, c])
    # b2_ref : (1, C) f32
    bb = x_ref.shape[0]
    mid = w1_ref.shape[1]
    inv_hw = 1.0 / float(hw)                       # compile-time constant

    # ---- avg-pool + linear1 (accumulated per channel, all f32, tiny) ----
    h = jnp.zeros((bb, mid), jnp.float32)
    for c in range(channels):                      # static unroll, C is small
        xc = x_ref[:, c * hw:(c + 1) * hw]         # (BB, HW) 128-aligned lane slice
        pooled_c = jnp.sum(xc.astype(jnp.float32), axis=-1, keepdims=True) * inv_hw
        h = h + pooled_c * w1_ref[c:c + 1, :]      # (BB, M)
    h = h + b1_ref[...]
    h = jnp.where(h >= 0.0, h, 0.2 * h)            # LeakyReLU(0.2)

    # ---- linear2 + sigmoid + per-channel scale of the feature rows ----
    for c in range(channels):
        a_c = jnp.sum(h * w2t_ref[c:c + 1, :], axis=-1, keepdims=True) + b2_ref[:, c:c + 1]
        a_c = jax.nn.sigmoid(a_c)                  # (BB, 1) f32, exp/recip -> EUP
        xc = x_ref[:, c * hw:(c + 1) * hw]
        o_ref[:, c * hw:(c + 1) * hw] = (xc.astype(jnp.float32) * a_c).astype(o_ref.dtype)


def _pick_batch_block(batch, row_bytes, itemsize, vmem_budget_bytes=8 << 20):
    """Batches (rows) per grid step.

    - dtype-aware sublane unit: 8 rows for 4-byte, 16 for bf16, 32 for int8/fp8
    - byte cap: (in + out) feature blocks are double-buffered by the pipeline,
      so ~4x the block bytes must stay well inside the scoped-VMEM defaults
      (16 MiB v5e, 32 MiB v6e/v7x; 64 MiB physical on v7x)
    - keeps >= 2 grid steps when the batch allows it (v7x TensorCore sharding)
    """
    unit = max(8, 32 // max(1, itemsize))
    cap = vmem_budget_bytes // (4 * max(1, row_bytes))
    cap = max(unit, (cap // unit) * unit)
    if batch >= 2 * unit:
        half = -(-batch // 2)                      # ceil(batch / 2)
        half = -(-half // unit) * unit             # rounded up to the sublane unit
        cap = min(cap, max(unit, half))
    if batch <= cap:
        return batch
    for bb in range(cap, unit - 1, -unit):         # prefer an exact divisor (no padded tail)
        if batch % bb == 0:
            return bb
    return cap                                     # padded tail block; rows are independent


def channel_attention_forward(feature, w1, b1, w2, b2):
    """feature: (B, C, H, W) NCHW; w1: (C, M), b1: (M,), w2: (M, C), b2: (C,).

    Matches the PyTorch module: feature * sigmoid(linear2(lrelu(linear1(avgpool(feature))))).
    (Weights are stored (in, out), i.e. already transposed vs. nn.Linear.weight.)
    """
    B, C, H, W = feature.shape
    HW = H * W
    CHW = C * HW
    M = w1.shape[1]
    itemsize = jnp.dtype(feature.dtype).itemsize

    BB = _pick_batch_block(B, CHW * itemsize, itemsize)
    grid = (pl.cdiv(B, BB),)

    # Lane-dense view: one batch per row, channels contiguous along the lane axis.
    x2d = feature.reshape(B, CHW)

    w1f = w1.astype(jnp.float32)                       # (C, M)
    b1f = b1.astype(jnp.float32).reshape(1, M)         # (1, M)
    w2tf = jnp.transpose(w2.astype(jnp.float32))       # (C, M)
    b2f = b2.astype(jnp.float32).reshape(1, C)         # (1, C)

    kernel = functools.partial(_ca_kernel, channels=C, hw=HW)

    # Only raise the scoped-VMEM limit if the streamed blocks actually need it.
    pipeline_bytes = 4 * BB * CHW * itemsize + 4 * (8 * 128 * 4)
    vmem_limit = None
    if pipeline_bytes > 12 * 1024 * 1024:
        vmem_limit = min(pipeline_bytes + (4 << 20), 48 * 1024 * 1024)

    cost = pl.CostEstimate(
        flops=2 * B * CHW + 4 * B * C * M,
        transcendentals=B * C,
        bytes_accessed=2 * B * CHW * itemsize + (2 * C * M + M + C) * 4,
    )

    out = pl.pallas_call(
        kernel,
        out_shape=jax.ShapeDtypeStruct((B, CHW), feature.dtype),
        grid_spec=pltpu.PrefetchScalarGridSpec(
            num_scalar_prefetch=0,
            grid=grid,
            in_specs=[
                pl.BlockSpec((BB, CHW), lambda i: (i, 0)),   # feature rows (streamed)
                pl.BlockSpec((C, M), lambda i: (0, 0)),      # w1   (grid-invariant, tiny)
                pl.BlockSpec((1, M), lambda i: (0, 0)),      # b1
                pl.BlockSpec((C, M), lambda i: (0, 0)),      # w2^T
                pl.BlockSpec((1, C), lambda i: (0, 0)),      # b2
            ],
            out_specs=pl.BlockSpec((BB, CHW), lambda i: (i, 0)),
        ),
        compiler_params=pltpu.CompilerParams(
            dimension_semantics=("parallel",),
            vmem_limit_bytes=vmem_limit),
        cost_estimate=cost,
    )(x2d, w1f, b1f, w2tf, b2f)

    return out.reshape(B, C, H, W)


def _reference(feature, w1, b1, w2, b2):
    """Pure-JAX reference of the PyTorch forward."""
    att = jnp.mean(feature, axis=(2, 3))                    # (B, C)
    att = att @ w1 + b1
    att = jnp.where(att >= 0, att, 0.2 * att)
    att = att @ w2 + b2
    att = jax.nn.sigmoid(att)
    return feature * att[:, :, None, None]


if __name__ == "__main__":
    # Small shapes consistent with the module: in_nc=4, mid_nc=8, size=16
    B, C, M, S = 2, 4, 8, 16

    key = jax.random.PRNGKey(0)
    k_x, k_w1, k_b1, k_w2, k_b2 = jax.random.split(key, 5)

    feature = jax.random.normal(k_x, (B, C, S, S), dtype=jnp.float32)

    # Deterministic init mimicking nn.Linear uniform(-1/sqrt(fan_in), 1/sqrt(fan_in))
    lim1 = 1.0 / jnp.sqrt(jnp.float32(C))
    lim2 = 1.0 / jnp.sqrt(jnp.float32(M))
    w1 = jax.random.uniform(k_w1, (C, M), minval=-lim1, maxval=lim1, dtype=jnp.float32)
    b1 = jax.random.uniform(k_b1, (M,), minval=-lim1, maxval=lim1, dtype=jnp.float32)
    w2 = jax.random.uniform(k_w2, (M, C), minval=-lim2, maxval=lim2, dtype=jnp.float32)
    b2 = jax.random.uniform(k_b2, (C,), minval=-lim2, maxval=lim2, dtype=jnp.float32)

    out = channel_attention_forward(feature, w1, b1, w2, b2)
    out = jax.block_until_ready(out)

    ref = _reference(feature, w1, b1, w2, b2)
    assert out.shape == (B, C, S, S)
    assert jnp.allclose(out, ref, atol=1e-5, rtol=1e-5), "mismatch vs reference"

    print("KERNEL_OK")
</pallas_src>

<mosaic_0001>
module attributes {stable_mosaic.version = 11 : i64} {
  func.func @_ca_kernel(%arg0: i32, %arg1: memref<2x1024xf32, #tpu.memory_space<vmem>>, %arg2: memref<4x8xf32, #tpu.memory_space<vmem>>, %arg3: memref<1x8xf32, #tpu.memory_space<vmem>>, %arg4: memref<4x8xf32, #tpu.memory_space<vmem>>, %arg5: memref<1x4xf32, #tpu.memory_space<vmem>>, %arg6: memref<2x1024xf32, #tpu.memory_space<vmem>>) attributes {dimension_semantics = [#tpu.dimension_semantics<parallel>], iteration_bounds = array<i64: 1>, scalar_prefetch = 0 : i64, scratch_operands = 0 : i64, tpu.core_type = #tpu.core_type<tc>, window_params = [{transform_indices = @transform_0, window_bounds = array<i64: 2, 1024>}, {pipeline_mode = #tpu.pipeline_mode<synchronous>, transform_indices = @transform_1, window_bounds = array<i64: 4, 8>}, {pipeline_mode = #tpu.pipeline_mode<synchronous>, transform_indices = @transform_2, window_bounds = array<i64: 1, 8>}, {pipeline_mode = #tpu.pipeline_mode<synchronous>, transform_indices = @transform_3, window_bounds = array<i64: 4, 8>}, {pipeline_mode = #tpu.pipeline_mode<synchronous>, transform_indices = @transform_4, window_bounds = array<i64: 1, 4>}, {transform_indices = @transform_5, window_bounds = array<i64: 2, 1024>}]} {
    %cst = arith.constant 0.000000e+00 : f32
    %0 = vector.broadcast %cst : f32 to vector<2x8xf32>
    %c0 = arith.constant 0 : index
    %c0_0 = arith.constant 0 : index
    %1 = vector.load %arg1[%c0, %c0_0] : memref<2x1024xf32, #tpu.memory_space<vmem>>, vector<2x256xf32>
    %cst_1 = arith.constant dense<0.000000e+00> : vector<2xf32>
    %2 = vector.multi_reduction <add>, %1, %cst_1 [1] : vector<2x256xf32> to vector<2xf32>
    %3 = vector.shape_cast %2 : vector<2xf32> to vector<2x1xf32>
    %cst_2 = arith.constant 3.906250e-03 : f32
    %4 = vector.broadcast %cst_2 : f32 to vector<2x1xf32>
    %5 = arith.mulf %3, %4 : vector<2x1xf32>
    %c0_3 = arith.constant 0 : index
    %c0_4 = arith.constant 0 : index
    %6 = vector.load %arg2[%c0_3, %c0_4] : memref<4x8xf32, #tpu.memory_space<vmem>>, vector<1x8xf32>
    %7 = vector.broadcast %5 : vector<2x1xf32> to vector<2x8xf32>
    %8 = vector.broadcast %6 : vector<1x8xf32> to vector<2x8xf32>
    %9 = arith.mulf %7, %8 : vector<2x8xf32>
    %10 = arith.addf %0, %9 : vector<2x8xf32>
    %c0_5 = arith.constant 0 : index
    %c256 = arith.constant 256 : index
    %11 = vector.load %arg1[%c0_5, %c256] : memref<2x1024xf32, #tpu.memory_space<vmem>>, vector<2x256xf32>
    %cst_6 = arith.constant dense<0.000000e+00> : vector<2xf32>
    %12 = vector.multi_reduction <add>, %11, %cst_6 [1] : vector<2x256xf32> to vector<2xf32>
    %13 = vector.shape_cast %12 : vector<2xf32> to vector<2x1xf32>
    %cst_7 = arith.constant 3.906250e-03 : f32
    %14 = vector.broadcast %cst_7 : f32 to vector<2x1xf32>
    %15 = arith.mulf %13, %14 : vector<2x1xf32>
    %c1 = arith.constant 1 : index
    %c0_8 = arith.constant 0 : index
    %16 = vector.load %arg2[%c1, %c0_8] : memref<4x8xf32, #tpu.memory_space<vmem>>, vector<1x8xf32>
    %17 = vector.broadcast %15 : vector<2x1xf32> to vector<2x8xf32>
    %18 = vector.broadcast %16 : vector<1x8xf32> to vector<2x8xf32>
    %19 = arith.mulf %17, %18 : vector<2x8xf32>
    %20 = arith.addf %10, %19 : vector<2x8xf32>
    %c0_9 = arith.constant 0 : index
    %c512 = arith.constant 512 : index
    %21 = vector.load %arg1[%c0_9, %c512] : memref<2x1024xf32, #tpu.memory_space<vmem>>, vector<2x256xf32>
    %cst_10 = arith.constant dense<0.000000e+00> : vector<2xf32>
    %22 = vector.multi_reduction <add>, %21, %cst_10 [1] : vector<2x256xf32> to vector<2xf32>
    %23 = vector.shape_cast %22 : vector<2xf32> to vector<2x1xf32>
    %cst_11 = arith.constant 3.906250e-03 : f32
    %24 = vector.broadcast %cst_11 : f32 to vector<2x1xf32>
    %25 = arith.mulf %23, %24 : vector<2x1xf32>
    %c2 = arith.constant 2 : index
    %c0_12 = arith.constant 0 : index
    %26 = vector.load %arg2[%c2, %c0_12] : memref<4x8xf32, #tpu.memory_space<vmem>>, vector<1x8xf32>
    %27 = vector.broadcast %25 : vector<2x1xf32> to vector<2x8xf32>
    %28 = vector.broadcast %26 : vector<1x8xf32> to vector<2x8xf32>
    %29 = arith.mulf %27, %28 : vector<2x8xf32>
    %30 = arith.addf %20, %29 : vector<2x8xf32>
    %c0_13 = arith.constant 0 : index
    %c768 = arith.constant 768 : index
    %31 = vector.load %arg1[%c0_13, %c768] : memref<2x1024xf32, #tpu.memory_space<vmem>>, vector<2x256xf32>
    %cst_14 = arith.constant dense<0.000000e+00> : vector<2xf32>
    %32 = vector.multi_reduction <add>, %31, %cst_14 [1] : vector<2x256xf32> to vector<2xf32>
    %33 = vector.shape_cast %32 : vector<2xf32> to vector<2x1xf32>
    %cst_15 = arith.constant 3.906250e-03 : f32
    %34 = vector.broadcast %cst_15 : f32 to vector<2x1xf32>
    %35 = arith.mulf %33, %34 : vector<2x1xf32>
    %c3 = arith.constant 3 : index
    %c0_16 = arith.constant 0 : index
    %36 = vector.load %arg2[%c3, %c0_16] : memref<4x8xf32, #tpu.memory_space<vmem>>, vector<1x8xf32>
    %37 = vector.broadcast %35 : vector<2x1xf32> to vector<2x8xf32>
    %38 = vector.broadcast %36 : vector<1x8xf32> to vector<2x8xf32>
    %39 = arith.mulf %37, %38 : vector<2x8xf32>
    %40 = arith.addf %30, %39 : vector<2x8xf32>
    %c0_17 = arith.constant 0 : index
    %c0_18 = arith.constant 0 : index
    %41 = vector.load %arg3[%c0_17, %c0_18] : memref<1x8xf32, #tpu.memory_space<vmem>>, vector<1x8xf32>
    %42 = vector.broadcast %41 : vector<1x8xf32> to vector<2x8xf32>
    %43 = arith.addf %40, %42 : vector<2x8xf32>
    %cst_19 = arith.constant 0.000000e+00 : f32
    %44 = vector.broadcast %cst_19 : f32 to vector<2x8xf32>
    %45 = arith.cmpf oge, %43, %44 : vector<2x8xf32>
    %cst_20 = arith.constant 2.000000e-01 : f32
    %46 = vector.broadcast %cst_20 : f32 to vector<2x8xf32>
    %47 = arith.mulf %46, %43 : vector<2x8xf32>
    %48 = arith.select %45, %43, %47 : vector<2x8xi1>, vector<2x8xf32>
    %c0_21 = arith.constant 0 : index
    %c0_22 = arith.constant 0 : index
    %49 = vector.load %arg4[%c0_21, %c0_22] : memref<4x8xf32, #tpu.memory_space<vmem>>, vector<1x8xf32>
    %50 = vector.broadcast %49 : vector<1x8xf32> to vector<2x8xf32>
    %51 = arith.mulf %48, %50 : vector<2x8xf32>
    %cst_23 = arith.constant dense<0.000000e+00> : vector<2xf32>
    %52 = vector.multi_reduction <add>, %51, %cst_23 [1] : vector<2x8xf32> to vector<2xf32>
    %53 = vector.shape_cast %52 : vector<2xf32> to vector<2x1xf32>
    %c0_24 = arith.constant 0 : index
    %c0_25 = arith.constant 0 : index
    %54 = vector.load %arg5[%c0_24, %c0_25] : memref<1x4xf32, #tpu.memory_space<vmem>>, vector<1x1xf32>
    %55 = vector.broadcast %54 : vector<1x1xf32> to vector<2x1xf32>
    %56 = arith.addf %53, %55 : vector<2x1xf32>
    %57 = arith.negf %56 : vector<2x1xf32>
    %58 = math.exp %57 : vector<2x1xf32>
    %cst_26 = arith.constant 1.000000e+00 : f32
    %59 = vector.broadcast %cst_26 : f32 to vector<2x1xf32>
    %60 = arith.addf %59, %58 : vector<2x1xf32>
    %61 = arith.divf %59, %60 : vector<2x1xf32>
    %c0_27 = arith.constant 0 : index
    %c0_28 = arith.constant 0 : index
    %62 = vector.load %arg1[%c0_27, %c0_28] : memref<2x1024xf32, #tpu.memory_space<vmem>>, vector<2x256xf32>
    %63 = vector.broadcast %61 : vector<2x1xf32> to vector<2x256xf32>
    %64 = arith.mulf %62, %63 : vector<2x256xf32>
    %c0_29 = arith.constant 0 : index
    %c0_30 = arith.constant 0 : index
    %65 = vector.load %arg6[%c0_29, %c0_30] : memref<2x1024xf32, #tpu.memory_space<vmem>>, vector<2x256xf32>
    tpu.vector_store %arg6[%c0_29, %c0_30], %64 {strides = array<i32>} : memref<2x1024xf32, #tpu.memory_space<vmem>>, vector<2x256xf32>,
    %c1_31 = arith.constant 1 : index
    %c0_32 = arith.constant 0 : index
    %66 = vector.load %arg4[%c1_31, %c0_32] : memref<4x8xf32, #tpu.memory_space<vmem>>, vector<1x8xf32>
    %67 = vector.broadcast %66 : vector<1x8xf32> to vector<2x8xf32>
    %68 = arith.mulf %48, %67 : vector<2x8xf32>
    %cst_33 = arith.constant dense<0.000000e+00> : vector<2xf32>
    %69 = vector.multi_reduction <add>, %68, %cst_33 [1] : vector<2x8xf32> to vector<2xf32>
    %70 = vector.shape_cast %69 : vector<2xf32> to vector<2x1xf32>
    %c0_34 = arith.constant 0 : index
    %c1_35 = arith.constant 1 : index
    %71 = vector.load %arg5[%c0_34, %c1_35] : memref<1x4xf32, #tpu.memory_space<vmem>>, vector<1x1xf32>
    %72 = vector.broadcast %71 : vector<1x1xf32> to vector<2x1xf32>
    %73 = arith.addf %70, %72 : vector<2x1xf32>
    %74 = arith.negf %73 : vector<2x1xf32>
    %75 = math.exp %74 : vector<2x1xf32>
    %cst_36 = arith.constant 1.000000e+00 : f32
    %76 = vector.broadcast %cst_36 : f32 to vector<2x1xf32>
    %77 = arith.addf %76, %75 : vector<2x1xf32>
    %78 = arith.divf %76, %77 : vector<2x1xf32>
    %c0_37 = arith.constant 0 : index
    %c256_38 = arith.constant 256 : index
    %79 = vector.load %arg1[%c0_37, %c256_38] : memref<2x1024xf32, #tpu.memory_space<vmem>>, vector<2x256xf32>
    %80 = vector.broadcast %78 : vector<2x1xf32> to vector<2x256xf32>
    %81 = arith.mulf %79, %80 : vector<2x256xf32>
    %c0_39 = arith.constant 0 : index
    %c256_40 = arith.constant 256 : index
    %82 = vector.load %arg6[%c0_39, %c256_40] : memref<2x1024xf32, #tpu.memory_space<vmem>>, vector<2x256xf32>
    tpu.vector_store %arg6[%c0_39, %c256_40], %81 {strides = array<i32>} : memref<2x1024xf32, #tpu.memory_space<vmem>>, vector<2x256xf32>,
    %c2_41 = arith.constant 2 : index
    %c0_42 = arith.constant 0 : index
    %83 = vector.load %arg4[%c2_41, %c0_42] : memref<4x8xf32, #tpu.memory_space<vmem>>, vector<1x8xf32>
    %84 = vector.broadcast %83 : vector<1x8xf32> to vector<2x8xf32>
    %85 = arith.mulf %48, %84 : vector<2x8xf32>
    %cst_43 = arith.constant dense<0.000000e+00> : vector<2xf32>
    %86 = vector.multi_reduction <add>, %85, %cst_43 [1] : vector<2x8xf32> to vector<2xf32>
    %87 = vector.shape_cast %86 : vector<2xf32> to vector<2x1xf32>
    %c0_44 = arith.constant 0 : index
    %c2_45 = arith.constant 2 : index
    %88 = vector.load %arg5[%c0_44, %c2_45] : memref<1x4xf32, #tpu.memory_space<vmem>>, vector<1x1xf32>
    %89 = vector.broadcast %88 : vector<1x1xf32> to vector<2x1xf32>
    %90 = arith.addf %87, %89 : vector<2x1xf32>
    %91 = arith.negf %90 : vector<2x1xf32>
    %92 = math.exp %91 : vector<2x1xf32>
    %cst_46 = arith.constant 1.000000e+00 : f32
    %93 = vector.broadcast %cst_46 : f32 to vector<2x1xf32>
    %94 = arith.addf %93, %92 : vector<2x1xf32>
    %95 = arith.divf %93, %94 : vector<2x1xf32>
    %c0_47 = arith.constant 0 : index
    %c512_48 = arith.constant 512 : index
    %96 = vector.load %arg1[%c0_47, %c512_48] : memref<2x1024xf32, #tpu.memory_space<vmem>>, vector<2x256xf32>
    %97 = vector.broadcast %95 : vector<2x1xf32> to vector<2x256xf32>
    %98 = arith.mulf %96, %97 : vector<2x256xf32>
    %c0_49 = arith.constant 0 : index
    %c512_50 = arith.constant 512 : index
    %99 = vector.load %arg6[%c0_49, %c512_50] : memref<2x1024xf32, #tpu.memory_space<vmem>>, vector<2x256xf32>
    tpu.vector_store %arg6[%c0_49, %c512_50], %98 {strides = array<i32>} : memref<2x1024xf32, #tpu.memory_space<vmem>>, vector<2x256xf32>,
    %c3_51 = arith.constant 3 : index
    %c0_52 = arith.constant 0 : index
    %100 = vector.load %arg4[%c3_51, %c0_52] : memref<4x8xf32, #tpu.memory_space<vmem>>, vector<1x8xf32>
    %101 = vector.broadcast %100 : vector<1x8xf32> to vector<2x8xf32>
    %102 = arith.mulf %48, %101 : vector<2x8xf32>
    %cst_53 = arith.constant dense<0.000000e+00> : vector<2xf32>
    %103 = vector.multi_reduction <add>, %102, %cst_53 [1] : vector<2x8xf32> to vector<2xf32>
    %104 = vector.shape_cast %103 : vector<2xf32> to vector<2x1xf32>
    %c0_54 = arith.constant 0 : index
    %c3_55 = arith.constant 3 : index
    %105 = vector.load %arg5[%c0_54, %c3_55] : memref<1x4xf32, #tpu.memory_space<vmem>>, vector<1x1xf32>
    %106 = vector.broadcast %105 : vector<1x1xf32> to vector<2x1xf32>
    %107 = arith.addf %104, %106 : vector<2x1xf32>
    %108 = arith.negf %107 : vector<2x1xf32>
    %109 = math.exp %108 : vector<2x1xf32>
    %cst_56 = arith.constant 1.000000e+00 : f32
    %110 = vector.broadcast %cst_56 : f32 to vector<2x1xf32>
    %111 = arith.addf %110, %109 : vector<2x1xf32>
    %112 = arith.divf %110, %111 : vector<2x1xf32>
    %c0_57 = arith.constant 0 : index
    %c768_58 = arith.constant 768 : index
    %113 = vector.load %arg1[%c0_57, %c768_58] : memref<2x1024xf32, #tpu.memory_space<vmem>>, vector<2x256xf32>
    %114 = vector.broadcast %112 : vector<2x1xf32> to vector<2x256xf32>
    %115 = arith.mulf %113, %114 : vector<2x256xf32>
    %c0_59 = arith.constant 0 : index
    %c768_60 = arith.constant 768 : index
    %116 = vector.load %arg6[%c0_59, %c768_60] : memref<2x1024xf32, #tpu.memory_space<vmem>>, vector<2x256xf32>
    tpu.vector_store %arg6[%c0_59, %c768_60], %115 {strides = array<i32>} : memref<2x1024xf32, #tpu.memory_space<vmem>>, vector<2x256xf32>,
    return
  }
  func.func @transform_0(%arg0: i32) -> (i32, i32) {
    %c0_i32 = arith.constant 0 : i32
    %c0_i32_0 = arith.constant 0 : i32
    return %arg0, %c0_i32 : i32, i32
  }
  func.func @transform_1(%arg0: i32) -> (i32, i32) {
    %c0_i32 = arith.constant 0 : i32
    %c0_i32_0 = arith.constant 0 : i32
    %c0_i32_1 = arith.constant 0 : i32
    return %c0_i32, %c0_i32_0 : i32, i32
  }
  func.func @transform_2(%arg0: i32) -> (i32, i32) {
    %c0_i32 = arith.constant 0 : i32
    %c0_i32_0 = arith.constant 0 : i32
    %c0_i32_1 = arith.constant 0 : i32
    return %c0_i32, %c0_i32_0 : i32, i32
  }
  func.func @transform_3(%arg0: i32) -> (i32, i32) {
    %c0_i32 = arith.constant 0 : i32
    %c0_i32_0 = arith.constant 0 : i32
    %c0_i32_1 = arith.constant 0 : i32
    return %c0_i32, %c0_i32_0 : i32, i32
  }
  func.func @transform_4(%arg0: i32) -> (i32, i32) {
    %c0_i32 = arith.constant 0 : i32
    %c0_i32_0 = arith.constant 0 : i32
    %c0_i32_1 = arith.constant 0 : i32
    return %c0_i32, %c0_i32_0 : i32, i32
  }
  func.func @transform_5(%arg0: i32) -> (i32, i32) {
    %c0_i32 = arith.constant 0 : i32
    %c0_i32_0 = arith.constant 0 : i32
    return %arg0, %c0_i32 : i32, i32
  }
}

</mosaic_0001>

<bundles_post_ra>
// kernel: tpu_custom_call.1
= control target key start
LH: loop header
LB: loop body
LE: loop exit
PB: predicated region body
PF: predicated region fallthrough
CT: control target
= control target key end

     0   :  { %10 = vsyncpa [#allocation3], 0  ;;  %s556_s0 = inlined_call_operand.hbm [shape: f32[2,1024], index: 0, kind: input, shape index: {}]   ;;  %s557_s1 = inlined_call_operand.hbm [shape: f32[4,8], index: 1, kind: input, shape index: {}]   ;;  %s558_s2 = inlined_call_operand.vmem [shape: f32[1,8], index: 2, kind: input, shape index: {}]   ;;  %s559_s3 = inlined_call_operand.vmem [shape: f32[4,8], index: 3, kind: input, shape index: {}]   ;;  %s560_s4 = inlined_call_operand.vmem [shape: f32[1,4], index: 4, kind: input, shape index: {}]   ;;  %s561_s5 = inlined_call_operand.hbm [shape: f32[2,1024], index: 5, kind: output, shape index: {}]  }
   0x1   :  { %11 = vsyncpa [#allocation6], 0 }
   0x2   :  { %12 = vsyncpa [#allocation4], 0  ;;  %s447_s18 = smov [#allocation2]   ;;  %s448_s20 = smov [#allocation5]  }
   0x3   :  { %s19_s19 = sshll.u32 %s447_s18, 4  ;;  %s29_s21 = sshll.u32 %s448_s20, 4  ;;  %s20_s19 = int_to_ptr.vmem [resolvable:$true] %s19_s19  ;;  %s30_s21 = int_to_ptr.vmem [resolvable:$true] %s29_s21 }
   0x4   :  { %s375_s24 = scalar_lea.hbm %s556_s0, 256 }
   0x5   :  { %p376_p0 = scmp.ne.s32.totalorder %s556_s0, %s375_s24  ;;  %p379_p1 = scmp.lt.u32.totalorder %s375_s24, %s556_s0 }
   0x7   :  { %p381_p2 = pnand %p379_p1, %p376_p0 }
   0x9   :  { %384 = shalt.err (!%p381_p2)
}
   0xa   :  { %s385_s29 = scalar_lea.vmem %s20_s19, 256  ;;  %p390_p4 = scmp.lt.s32.totalorder %s20_s19, %s20_s19 }
   0xb   :  { %p386_p3 = scmp.ne.s32.totalorder %s20_s19, %s385_s29  ;;  %p391_p5 = scmp.lt.s32.totalorder %s385_s29, %s385_s29 }
   0xd   :  { %p392_p6 = por %p391_p5, %p390_p4 }
   0xf   :  { %p393_p7 = pnand %p392_p6, %p386_p3 }
  0x11   :  { %396 = shalt.err (!%p393_p7)
}
  0x12   :  { %22 = dma.hbm_to_vmem [thread:$0]  %s556_s0, 256, %s20_s19, [#allocation3]  }
  0x13   :  { %s397_s9 = scalar_lea.hbm %s557_s1, 64 }
  0x14   :  { %p398_p8 = scmp.ne.s32.totalorder %s557_s1, %s397_s9  ;;  %p401_p9 = scmp.lt.u32.totalorder %s397_s9, %s557_s1 }
  0x16   :  { %p403_p10 = pnand %p401_p9, %p398_p8 }
  0x18   :  { %406 = shalt.err (!%p403_p10)
}
  0x19   :  { %s407_s14 = scalar_lea.vmem %s30_s21, 64  ;;  %p412_p12 = scmp.lt.s32.totalorder %s30_s21, %s30_s21 }
  0x1a   :  { %p408_p11 = scmp.ne.s32.totalorder %s30_s21, %s407_s14  ;;  %p413_p13 = scmp.lt.s32.totalorder %s407_s14, %s407_s14 }
  0x1c   :  { %p414_p0 = por %p413_p13, %p412_p12 }
  0x1e   :  { %p415_p1 = pnand %p414_p0, %p408_p11 }
  0x20   :  { %418 = shalt.err (!%p415_p1)
}
  0x21   :  { %32 = dma.hbm_to_vmem [thread:$0]  %s557_s1, 64, %s30_s21, [#allocation6]  }
  0x22   :  { %441 = dma.done.wait [#allocation3], 256  }
  0x23   :  { %442 = vsyncadd [#allocation3], 4294967040 }
  0x24   :  { %443 = dma.done.wait [#allocation6], 64  }
  0x25   :  { %444 = vsyncadd [#allocation6], 4294967232  ;;  %v50_v0 = vlaneseq  ;;  %v449_v1 = vmov 1983009808   ;;  %vm57_vm0 = vcmask 1041408   ;;  %vm163_vm2 = vcmask 58368  }
  0x26   :  { %v48_v2 = vunpack.c.l.s4 %v449_v1  ;;  %v513_v6 = vld [vmem:[#allocation2] sm:$0xf]  ;;  %v328_v7 = vld.sshfl [vmem:[#allocation2 + $0x8] sm:$0x33 pattern:$0x76325410] }
  0x27   :  { %v510_v3 = vshrl.u32 %v50_v0, 7  ;;  %v105_v9 = vcombine.high %v328_v7, %v328_v7  ;;  %v108_v10 = vsel %vm57_vm0, %v328_v7, 0.0  ;;  %v326_v11 = vld.sshfl [vmem:[#allocation2 + $0x4] sm:$0x33 pattern:$0x76325410] }
  0x28   :  { %v49_v4 = vunpack.c.0.s8 %v48_v2  ;;  %v80_v12 = vcombine.high %v326_v11, %v326_v11  ;;  %v330_v13 = vld.sshfl [vmem:[#allocation2 + $0xc] sm:$0x33 pattern:$0x76325410]  ;;  %v83_v21 = vsel %vm57_vm0, %v326_v11, 0.0  ;;  %v450_v62 = vmov 1  }
  0x29   :  { %v109_v16 = vsel %vm57_vm0, %v105_v9, 0.0  ;;  %v130_v17 = vcombine.high %v330_v13, %v330_v13  ;;  %v133_v19 = vsel %vm57_vm0, %v330_v13, 0.0  ;;  %v325_v31 = vld [vmem:[#allocation5] ss:$0 sm:$0xff]  ;;  %v327_v32 = vld [vmem:[#allocation5 + $0x1] ss:$0 sm:$0xff]  ;;  %355 = vset.pattern.permute.xlu1 %v450_v62 }
  0x2a   :  { %v52_v5 = vsub.s32 %v49_v4, %v510_v3  ;;  %v110_v18 = vadd.f32 %v109_v16, %v108_v10  ;;  %v84_v22 = vsel %vm57_vm0, %v80_v12, 0.0  ;;  %v329_v37 = vld [vmem:[#allocation5 + $0x2] ss:$0 sm:$0xff]  ;;  %v331_v38 = vld [vmem:[#allocation5 + $0x3] ss:$0 sm:$0xff]  ;;  %v451_v63 = vmov 0  }
  0x2b   :  { %v134_v23 = vsel %vm57_vm0, %v130_v17, 0.0  ;;  %v85_v26 = vadd.f32 %v84_v22, %v83_v21  ;;  %v332_v45 = vld [vmem:[%s558_s2] ss:$0 sm:$0xff]  ;;  %v336_v48 = vld [vmem:[%s559_s3 + $0x1] ss:$0 sm:$0xff]  ;;  %354 = vset.pattern.permute.xlu0 %v451_v63 }
  0x2c   :  { %v53_v8 = vrot.slane %v513_v6, %v52_v5  ;;  %111 = vadd.xlane.f32.xlu1 %v110_v18  ;;  %v135_v25 = vadd.f32 %v134_v23, %v133_v19  ;;  %v333_v50 = vld [vmem:[%s559_s3] ss:$0 sm:$0xff]  ;;  %v342_v52 = vld [vmem:[%s559_s3 + $0x3] ss:$0 sm:$0xff]  ;;  %v339_v53 = vld [vmem:[%s559_s3 + $0x2] ss:$0 sm:$0xff] }
  0x2d   :  { %v337_v0 = vld [vmem:[%s560_s4] ss:$0 sm:$0xff]  ;;  %s455_s3 = smov [#allocation7]  }
  0x2e   :  { %v54_v14 = vcombine.high %v53_v8, %v53_v8  ;;  %v58_v15 = vsel %vm57_vm0, %v53_v8, 0.0  ;;  %s315_s4 = sshll.u32 %s455_s3, 4  ;;  %s316_s4 = int_to_ptr.vmem [resolvable:$true] %s315_s4 }
  0x2f   :  { %s419_s26 = scalar_lea.vmem %s316_s4, 256  ;;  %p424_p3 = scmp.lt.s32.totalorder %s316_s4, %s316_s4 }
  0x30   :  { %v59_v20 = vsel %vm57_vm0, %v54_v14, 0.0  ;;  %136 = vadd.xlane.f32.xlu1 %v135_v25  ;;  %p420_p2 = scmp.ne.s32.totalorder %s316_s4, %s419_s26  ;;  %p425_p4 = scmp.lt.s32.totalorder %s419_s26, %s419_s26 }
  0x31   :  { %v60_v24 = vadd.f32 %v59_v20, %v58_v15 }
  0x32   :  { %p426_p5 = por %p425_p4, %p424_p3 }
  0x33   :  { %61 = vadd.xlane.f32.xlu0 %v60_v24 }
  0x34   :  { %p427_p6 = pnand %p426_p5, %p420_p2 }
  0x37   :  { %86 = vadd.xlane.f32.xlu0 %v85_v26  ;;  %v452_v26 = vmov 2  }
  0xb9   :  { %v112_v27 = vpop.xlane.xlu1 %111 }
  0xba   :  { %v113_v34 = vmul.f32 0.00390625, %v112_v27  ;;  %v453_v27 = vmov 3  }
  0xbc   :  { %v119_v41 = vmul.f32 %v329_v37, %v113_v34 }
  0xbd   :  { %v137_v29 = vpop.xlane.xlu1 %136 }
  0xbe   :  { %v138_v36 = vmul.f32 0.00390625, %v137_v29  ;;  %v454_v29 = vmov 269488144  }
  0xc0   :  { %v62_v28 = vpop.xlane.xlu0 %61  ;;  %v144_v43 = vmul.f32 %v331_v38, %v138_v36 }
  0xc1   :  { %v63_v30 = vmul.f32 0.00390625, %v62_v28 }
  0xc3   :  { %v69_v39 = vmul.f32 %v325_v31, %v63_v30  ;;  %v186_v30 = vunpack.c.l.s4 %v454_v29 }
  0xc4   :  { %v87_v33 = vpop.xlane.xlu0 %86 }
  0xc5   :  { %v88_v35 = vmul.f32 0.00390625, %v87_v33  ;;  %v187_v31 = vunpack.c.0.s8 %v186_v30  ;;  %v218_v33 = vld [vmem:[#allocation2 + $0x4] sm:$0xf] }
  0xc7   :  { %v94_v40 = vmul.f32 %v327_v32, %v88_v35  ;;  %v190_v32 = vsub.s32 %v187_v31, %v510_v3 }
  0xc9   :  { %v95_v42 = vadd.f32 %v94_v40, %v69_v39  ;;  %v256_v40 = vld [vmem:[#allocation2 + $0x8] sm:$0xf] }
  0xcb   :  { %v120_v44 = vadd.f32 %v119_v41, %v95_v42 }
  0xcd   :  { %v145_v46 = vadd.f32 %v144_v43, %v120_v44  ;;  %v294_v44 = vld [vmem:[#allocation2 + $0xc] sm:$0xf] }
  0xcf   :  { %v153_v47 = vadd.f32 %v332_v45, %v145_v46 }
  0xd1   :  { %vm154_vm1 = vcmp.ge.f32.partialorder %v153_v47, 0.0  ;;  %v155_v49 = vmul.f32 0.2, %v153_v47 }
  0xd3   :  { %v156_v51 = vsel %vm154_vm1, %v153_v47, %v155_v49 }
  0xd4   :  { %v200_v54 = vmul.f32 %v336_v48, %v156_v51  ;;  %v162_v55 = vmul.f32 %v333_v50, %v156_v51  ;;  %v276_v58 = vmul.f32 %v342_v52, %v156_v51  ;;  %v238_v59 = vmul.f32 %v339_v53, %v156_v51 }
  0xd6   :  { %v201_v56 = vsel %vm163_vm2, %v200_v54, 0.0  ;;  %v164_v57 = vsel %vm163_vm2, %v162_v55, 0.0  ;;  %v277_v60 = vsel %vm163_vm2, %v276_v58, 0.0  ;;  %v239_v61 = vsel %vm163_vm2, %v238_v59, 0.0 }
  0xd7   :  { %202 = vadd.xlane.f32.xlu1 %v201_v56  ;;  %165 = vadd.xlane.f32.xlu0 %v164_v57 }
  0xdb   :  { %278 = vadd.xlane.f32.xlu1 %v277_v60  ;;  %240 = vadd.xlane.f32.xlu0 %v239_v61 }
 0x164   :  { %v203_v1 = vpop.xlane.xlu1 %202  ;;  %v166_v2 = vpop.xlane.xlu0 %165 }
 0x165   :  { %v211_v4 = vadd.f32 %v337_v0, %v203_v1  ;;  %v174_v5 = vadd.f32 %v337_v0, %v166_v2 }
 0x167   :  { %v338_v7 = vmul.f32 -1.442695, %v211_v4  ;;  %v335_v8 = vmul.f32 -1.442695, %v174_v5 }
 0x168   :  { %v279_v9 = vpop.xlane.xlu1 %278  ;;  %v241_v10 = vpop.xlane.xlu0 %240 }
 0x169   :  { %359 = vpow2.f32 %v338_v7  ;;  %v287_v11 = vadd.f32 %v337_v0, %v279_v9  ;;  %v249_v12 = vadd.f32 %v337_v0, %v241_v10 }
 0x16a   :  { %361 = vpow2.f32 %v335_v8 }
 0x16b   :  { %v344_v13 = vmul.f32 -1.442695, %v287_v11  ;;  %v341_v14 = vmul.f32 -1.442695, %v249_v12 }
 0x16d   :  { %363 = vpow2.f32 %v341_v14 }
 0x16e   :  { %365 = vpow2.f32 %v344_v13 }
 0x173   :  { %v360_v15 = vpop.eup %359 }
 0x174   :  { %v362_v16 = vpop.eup %361  ;;  %v215_v17 = vadd.f32 1.0, %v360_v15 }
 0x175   :  { %v178_v18 = vadd.f32 1.0, %v362_v16 }
 0x176   :  { %367 = vrcp.f32 %v215_v17 }
 0x177   :  { %369 = vrcp.f32 %v178_v18  ;;  %v364_v19 = vpop.eup %363 }
 0x178   :  { %v366_v20 = vpop.eup %365  ;;  %v253_v21 = vadd.f32 1.0, %v364_v19 }
 0x179   :  { %v291_v22 = vadd.f32 1.0, %v366_v20 }
 0x17a   :  { %371 = vrcp.f32 %v253_v21 }
 0x17b   :  { %373 = vrcp.f32 %v291_v22 }
 0x180   :  { %v368_v23 = vpop.eup %367 }
 0x181   :  { %v370_v24 = vpop.eup %369  ;;  %221 = vperm.xlu1 %355, %v368_v23  }
 0x182   :  { %183 = vperm.xlu0 %354, %v370_v24  }
 0x184   :  { %v372_v25 = vpop.eup %371 }
 0x185   :  { %356 = vset.pattern.permute.xlu1 %v452_v26  ;;  %v374_v28 = vpop.eup %373 }
 0x186   :  { %259 = vperm.xlu1 %356, %v372_v25   ;;  %358 = vset.pattern.permute.xlu0 %v453_v27 }
 0x18a   :  { %357 = vset.pattern.permute.xlu1 %v453_v27 }
 0x18b   :  { %297 = vperm.xlu1 %357, %v374_v28  }
 0x200   :  { %v222_v34 = vpop.permute.xlu1 %221 }
 0x201   :  { %v229_v35 = vrot.slane %v222_v34, %v190_v32  ;;  %v184_v36 = vpop.permute.xlu0 %183 }
 0x202   :  { %v191_v37 = vrot.slane %v184_v36, %v190_v32 }
 0x203   :  { %v231_v38 = vmul.f32 %v229_v35, %v218_v33 }
 0x204   :  { %v193_v39 = vmul.f32 %v191_v37, %v513_v6 }
 0x205   :  { %232 = vst [vmem:[#allocation7 + $0x4] sm:$0xf] %v231_v38  ;;  %v260_v41 = vpop.permute.xlu1 %259 }
 0x206   :  { %194 = vst [vmem:[#allocation7] sm:$0xf] %v193_v39  ;;  %v267_v42 = vrot.slane %v260_v41, %v190_v32 }
 0x208   :  { %v269_v43 = vmul.f32 %v267_v42, %v256_v40 }
 0x20a   :  { %270 = vst [vmem:[#allocation7 + $0x8] sm:$0xf] %v269_v43  ;;  %v298_v45 = vpop.permute.xlu1 %297 }
 0x20b   :  { %v305_v3 = vrot.slane %v298_v45, %v190_v32 }
 0x20d   :  { %v307_v46 = vmul.f32 %v305_v3, %v294_v44 }
 0x20f   :  { %308 = vst [vmem:[#allocation7 + $0xc] sm:$0xf] %v307_v46 }
 0x210   :  { %430 = shalt.err (!%p427_p6)
}
 0x211   :  { %s431_s29 = scalar_lea.hbm %s561_s5, 256 }
 0x212   :  { %p432_p7 = scmp.ne.s32.totalorder %s561_s5, %s431_s29  ;;  %p435_p8 = scmp.lt.u32.totalorder %s431_s29, %s561_s5 }
 0x214   :  { %p437_p9 = pnand %p435_p8, %p432_p7 }
 0x216   :  { %440 = shalt.err (!%p437_p9)
}
 0x217   :  { %318 = dma.vmem_to_hbm [thread:$0]  %s316_s4, 256, %s561_s5, [#allocation4]  }
 0x218   :  { %445 = dma.done.wait [#allocation4], 256  }
 0x219   :  { %446 = vsyncadd [#allocation4], 4294967040 }
 0x21a   :  { %322 = vsyncpa [#allocation3], 1 }
 0x21b   :  { %323 = vsyncpa [#allocation6], 1 }
 0x21c   :  { %324 = vsyncpa [#allocation4], 1 }

</bundles_post_ra>
